<compile_context>
chip_gen: v7x
topology: tpu7x:2x2x1
jax: 0.10.0
libtpu: 0.0.40
codegen_flags: <defaults>
</compile_context>

<pallas_src>
import functools

import numpy as np

import jax
import jax.numpy as jnp
from jax.experimental import pallas as pl
from jax.experimental.pallas import tpu as pltpu

_HALO = 8  # sublane-aligned halo block (must cover k_max - 1 rows)


def _round_up(x, m):
    return ((x + m - 1) // m) * m


def _textcnn_kernel(k_max, x_ref, halo_ref, wc_ref, bc_ref, lim_ref, wd_ref,
                    out_ref, acc_ref):
    """One (batch tile, seq tile) step of the fused TextCNN forward."""
    l = pl.program_id(1)

    @pl.when(l == 0)
    def _init():
        # ReLU output is >= 0, so 0 is the identity for the running max.
        acc_ref[...] = jnp.zeros_like(acc_ref)

    x = x_ref[...]                                    # (TB, TL, C) bf16
    tb, tl, c = x.shape
    if k_max > 1:
        halo = halo_ref[:, : k_max - 1, :]            # (TB, k_max-1, C) bf16
        slab = jnp.concatenate([x, halo], axis=1)     # (TB, TL+k_max-1, C)
    else:
        slab = x

    # im2row once: all taps of all branches as a single lane-dense bf16 matmul
    # (K = k_max*C feeds the MXU far better than k_max separate C-deep dots).
    lhs = jnp.concatenate([slab[:, t:t + tl, :] for t in range(k_max)], axis=-1)
    lhs = lhs.reshape(tb * tl, k_max * c)             # (TB*TL, k_max*C)
    conv = jnp.dot(lhs, wc_ref[...], preferred_element_type=jnp.float32)
    conv = jnp.maximum(conv + bc_ref[...], 0.0)       # bias + ReLU in f32 (VPU)
    conv = conv.reshape(tb, tl, -1)                   # (TB, TL, Cpad)

    # Mask positions that are not valid conv outputs for a given branch
    # (tail of shorter kernels, sequence padding); 0 is safe since ReLU >= 0.
    pos = l * tl + jax.lax.broadcasted_iota(jnp.int32, conv.shape, 1)
    valid = pos < lim_ref[...].reshape(1, 1, -1)
    chunk_max = jnp.max(jnp.where(valid, conv, 0.0), axis=1)   # (TB, Cpad)
    acc_ref[...] = jnp.maximum(acc_ref[...], chunk_max)

    @pl.when(l == pl.num_programs(1) - 1)
    def _finalize():
        # Global max pool finished; decoder projection on the 128-lane padded
        # output (lane-dense store).  Dropout(p=0.5) is identity at inference;
        # decoder bias is folded in the wrapper.  Kept in f32 to match the
        # reference numerics; this runs once per batch tile.
        out_ref[...] = jnp.dot(acc_ref[...], wd_ref[...].astype(jnp.float32),
                               preferred_element_type=jnp.float32)


def pack_textcnn_params(params, kernel_sizes, num_channels, seq_len):
    """Pack per-branch Conv1d weights (PyTorch (Cout, Cin, k)) into one
    lane-dense slab, done once off the hot path:
      wc : (k_max*C, Cpad) bf16   taps zero-padded to k_max, branches stacked
                                  on out-channels, padded to a multiple of 128
      bc : (1, Cpad) f32          packed conv biases
      lim: (1, Cpad) i32          #valid conv positions per out-channel
      wd : (Cpad, 128) bf16       decoder weight, zero-padded rows/cols
    """
    k_max = max(kernel_sizes)
    c_in = params["conv_w"][0].shape[1]
    f_total = sum(num_channels)
    cpad = _round_up(f_total, 128)
    ncls = params["decoder_w"].shape[1]
    ncls_pad = _round_up(ncls, 128)

    wc = np.zeros((k_max, c_in, cpad), np.float32)
    bc = np.zeros((1, cpad), np.float32)
    lim = np.zeros((1, cpad), np.int32)
    off = 0
    for k, c, w, b in zip(kernel_sizes, num_channels,
                          params["conv_w"], params["conv_b"]):
        wc[:k, :, off:off + c] = np.transpose(np.asarray(w), (2, 1, 0))
        bc[0, off:off + c] = np.asarray(b)
        lim[0, off:off + c] = seq_len - k + 1
        off += c

    wd = np.zeros((cpad, ncls_pad), np.float32)
    wd[:f_total, :ncls] = np.asarray(params["decoder_w"])

    return {
        "wc": jnp.asarray(wc.reshape(k_max * c_in, cpad), jnp.bfloat16),
        "bc": jnp.asarray(bc),
        "lim": jnp.asarray(lim),
        "wd": jnp.asarray(wd, jnp.bfloat16),
    }


def textcnn_forward(tokens, params, packed, kernel_sizes, num_channels,
                    *, tb=8, tl=None):
    B, L = tokens.shape
    k_max = max(kernel_sizes)
    need = L + k_max - 1                 # rows so every conv tap stays in-bounds
    if tl is None:
        # Biggest seq tile up to 128 rows; short sequences only pad to the
        # next multiple of 8 (fewer grid steps = less per-step overhead).
        tl = max(_HALO, min(128, _round_up(need, _HALO)))
    assert tb % 8 == 0 and tl % 8 == 0 and tl >= _HALO
    assert k_max - 1 <= _HALO

    # --- glue: embedding gathers + channel concat, fed to the kernel in bf16 ---
    # TODO(synk): fuse this gather into the kernel via scalar-prefetched token
    # ids + pl.ANY embedding tables to remove the HBM round trip of x.
    emb = jnp.take(params["embedding"], tokens, axis=0)
    cemb = jnp.take(params["constant_embedding"], tokens, axis=0)
    x = jnp.concatenate([emb, cemb], axis=-1).astype(jnp.bfloat16)  # (B, L, C)
    C = x.shape[-1]

    bp = _round_up(B, tb)
    lp = _round_up(need, tl)
    x = jnp.pad(x, ((0, bp - B), (0, lp - L), (0, 0)))

    cpad = packed["wc"].shape[1]
    ncls_pad = packed["wd"].shape[1]
    ncls = params["decoder_w"].shape[1]
    nb, nl = bp // tb, lp // tl
    halo_last = lp // _HALO - 1

    x_spec = pl.BlockSpec((tb, tl, C), lambda b, l: (b, l, 0))
    halo_spec = pl.BlockSpec(
        (tb, _HALO, C),
        lambda b, l: (b, jnp.minimum((l + 1) * (tl // _HALO), halo_last), 0))
    const2 = lambda b, l: (0, 0)

    out = pl.pallas_call(
        functools.partial(_textcnn_kernel, k_max),
        out_shape=jax.ShapeDtypeStruct((bp, ncls_pad), jnp.float32),
        grid_spec=pltpu.PrefetchScalarGridSpec(
            num_scalar_prefetch=0,
            grid=(nb, nl),
            in_specs=[
                x_spec,                                       # main x tile
                halo_spec,                                    # conv-window halo
                pl.BlockSpec((k_max * C, cpad), const2),      # packed conv W
                pl.BlockSpec((1, cpad), const2),              # packed conv bias
                pl.BlockSpec((1, cpad), const2),              # valid-pos limits
                pl.BlockSpec((cpad, ncls_pad), const2),       # decoder W
            ],
            out_specs=pl.BlockSpec((tb, ncls_pad), lambda b, l: (b, 0)),
            scratch_shapes=[pltpu.VMEM((tb, cpad), jnp.float32)],
        ),
        compiler_params=pltpu.CompilerParams(
            dimension_semantics=("parallel", "arbitrary"),
            vmem_limit_bytes=32 * 1024 * 1024,
        ),
    )(x, x, packed["wc"], packed["bc"], packed["lim"], packed["wd"])

    # Strip batch/class padding; decoder bias folded here (out of the hot loop).
    return out[:B, :ncls] + params["decoder_b"]


def textcnn_reference(tokens, params, kernel_sizes):
    """Pure-JAX reference with identical (bf16-input, f32-accumulate) semantics."""
    emb = jnp.take(params["embedding"], tokens, axis=0)
    cemb = jnp.take(params["constant_embedding"], tokens, axis=0)
    x = jnp.concatenate([emb, cemb], axis=-1).astype(jnp.bfloat16)  # (B, L, C)
    L = x.shape[1]
    encs = []
    for k, w, b in zip(kernel_sizes, params["conv_w"], params["conv_b"]):
        wk = w.astype(jnp.bfloat16)              # PyTorch layout (Cout, Cin, k)
        lout = L - k + 1
        acc = sum(jnp.einsum("blc,oc->blo", x[:, t:t + lout, :], wk[:, :, t],
                             preferred_element_type=jnp.float32)
                  for t in range(k))
        acc = jax.nn.relu(acc + b[None, None, :])
        encs.append(jnp.max(acc, axis=1))        # global max pool -> (B, Cout)
    enc = jnp.concatenate(encs, axis=-1)         # (B, sum(Cout)) f32
    wd = params["decoder_w"].astype(jnp.bfloat16).astype(jnp.float32)
    return (jnp.dot(enc, wd, precision=jax.lax.Precision.HIGHEST)
            + params["decoder_b"])


def init_params(key, vocab_size, embed_size, kernel_sizes, num_channels,
                num_classes=2):
    n = len(kernel_sizes)
    keys = jax.random.split(key, 4 + 2 * n)
    c_in = 2 * embed_size
    params = {
        "embedding": 0.1 * jax.random.normal(
            keys[0], (vocab_size, embed_size), jnp.float32),
        "constant_embedding": 0.1 * jax.random.normal(
            keys[1], (vocab_size, embed_size), jnp.float32),
        "conv_w": [],
        "conv_b": [],
        # nn.Linear(sum(num_channels), 2) weight stored transposed: (F, 2).
        "decoder_w": 0.1 * jax.random.normal(
            keys[2], (sum(num_channels), num_classes), jnp.float32),
        "decoder_b": 0.01 * jax.random.normal(
            keys[3], (num_classes,), jnp.float32),
    }
    for i, (k, c) in enumerate(zip(kernel_sizes, num_channels)):
        # PyTorch Conv1d weight layout: (out_channels, in_channels, kernel).
        params["conv_w"].append(
            0.1 * jax.random.normal(keys[4 + 2 * i], (c, c_in, k), jnp.float32))
        params["conv_b"].append(
            0.01 * jax.random.normal(keys[5 + 2 * i], (c,), jnp.float32))
    return params


if __name__ == "__main__":
    # Small synthetic config consistent with the module's __init__.
    vocab_size = 50
    embed_size = 16          # -> conv in_channels = 32
    kernel_sizes = (3, 4, 5)
    num_channels = (8, 8, 8)
    batch, seq_len = 2, 16

    key = jax.random.PRNGKey(0)
    k_tok, k_par = jax.random.split(key)
    tokens = jax.random.randint(k_tok, (batch, seq_len), 0, vocab_size,
                                dtype=jnp.int32)
    params = init_params(k_par, vocab_size, embed_size, kernel_sizes,
                         num_channels)
    packed = pack_textcnn_params(params, kernel_sizes, num_channels, seq_len)

    fwd = jax.jit(textcnn_forward,
                  static_argnames=("kernel_sizes", "num_channels", "tb", "tl"))
    out = jax.block_until_ready(
        fwd(tokens, params, packed, kernel_sizes, num_channels))

    ref = jax.block_until_ready(textcnn_reference(tokens, params, kernel_sizes))
    assert out.shape == (batch, 2), out.shape
    assert jnp.allclose(out, ref, rtol=1e-4, atol=1e-4), (out, ref)

    print("KERNEL_OK")
</pallas_src>

<mosaic_0001>
module attributes {stable_mosaic.version = 11 : i64} {
  func.func @_textcnn_kernel(%arg0: i32, %arg1: i32, %arg2: memref<8x24x32xbf16, #tpu.memory_space<vmem>>, %arg3: memref<8x8x32xbf16, #tpu.memory_space<vmem>>, %arg4: memref<160x128xbf16, #tpu.memory_space<vmem>>, %arg5: memref<1x128xf32, #tpu.memory_space<vmem>>, %arg6: memref<1x128xi32, #tpu.memory_space<vmem>>, %arg7: memref<128x128xbf16, #tpu.memory_space<vmem>>, %arg8: memref<8x128xf32, #tpu.memory_space<vmem>>, %arg9: memref<8x128xf32, #tpu.memory_space<vmem>>) attributes {dimension_semantics = [#tpu.dimension_semantics<parallel>, #tpu.dimension_semantics<arbitrary>], iteration_bounds = array<i64: 1, 1>, scalar_prefetch = 0 : i64, scratch_operands = 1 : i64, tpu.core_type = #tpu.core_type<tc>, window_params = [{transform_indices = @transform_0, window_bounds = array<i64: 8, 24, 32>}, {transform_indices = @transform_1, window_bounds = array<i64: 8, 8, 32>}, {pipeline_mode = #tpu.pipeline_mode<synchronous>, transform_indices = @transform_2, window_bounds = array<i64: 160, 128>}, {pipeline_mode = #tpu.pipeline_mode<synchronous>, transform_indices = @transform_3, window_bounds = array<i64: 1, 128>}, {pipeline_mode = #tpu.pipeline_mode<synchronous>, transform_indices = @transform_4, window_bounds = array<i64: 1, 128>}, {pipeline_mode = #tpu.pipeline_mode<synchronous>, transform_indices = @transform_5, window_bounds = array<i64: 128, 128>}, {transform_indices = @transform_6, window_bounds = array<i64: 8, 128>}]} {
    %c0_i32 = arith.constant 0 : i32
    %0 = arith.cmpi eq, %arg1, %c0_i32 : i32
    %1 = arith.extui %0 : i1 to i32
    %c0_i32_0 = arith.constant 0 : i32
    %2 = arith.cmpi ne, %1, %c0_i32_0 : i32
    scf.if %2 {
      %cst_21 = arith.constant 0.000000e+00 : f32
      %38 = vector.broadcast %cst_21 : f32 to vector<8x128xf32>
      %c0_22 = arith.constant 0 : index
      %c0_23 = arith.constant 0 : index
      %39 = vector.load %arg9[%c0_22, %c0_23] : memref<8x128xf32, #tpu.memory_space<vmem>>, vector<8x128xf32>
      tpu.vector_store %arg9[%c0_22, %c0_23], %38 {strides = array<i32>} : memref<8x128xf32, #tpu.memory_space<vmem>>, vector<8x128xf32>,
    } else {
    }
    %c0 = arith.constant 0 : index
    %c0_1 = arith.constant 0 : index
    %c0_2 = arith.constant 0 : index
    %3 = vector.load %arg2[%c0, %c0_1, %c0_2] : memref<8x24x32xbf16, #tpu.memory_space<vmem>>, vector<8x24x32xbf16>
    %c0_3 = arith.constant 0 : index
    %c0_4 = arith.constant 0 : index
    %c0_5 = arith.constant 0 : index
    %4 = vector.load %arg3[%c0_3, %c0_4, %c0_5] : memref<8x8x32xbf16, #tpu.memory_space<vmem>>, vector<8x4x32xbf16>
    %5 = tpu.concatenate %3, %4 in 1 : vector<8x24x32xbf16>, vector<8x4x32xbf16> -> vector<8x28x32xbf16>
    %6 = vector.extract_strided_slice %5 {offsets = [0, 0, 0], sizes = [8, 24, 32], strides = [1, 1, 1]} : vector<8x28x32xbf16> to vector<8x24x32xbf16>
    %7 = vector.extract_strided_slice %5 {offsets = [0, 1, 0], sizes = [8, 24, 32], strides = [1, 1, 1]} : vector<8x28x32xbf16> to vector<8x24x32xbf16>
    %8 = vector.extract_strided_slice %5 {offsets = [0, 2, 0], sizes = [8, 24, 32], strides = [1, 1, 1]} : vector<8x28x32xbf16> to vector<8x24x32xbf16>
    %9 = vector.extract_strided_slice %5 {offsets = [0, 3, 0], sizes = [8, 24, 32], strides = [1, 1, 1]} : vector<8x28x32xbf16> to vector<8x24x32xbf16>
    %10 = vector.extract_strided_slice %5 {offsets = [0, 4, 0], sizes = [8, 24, 32], strides = [1, 1, 1]} : vector<8x28x32xbf16> to vector<8x24x32xbf16>
    %11 = tpu.concatenate %6, %7, %8, %9, %10 in 2 : vector<8x24x32xbf16>, vector<8x24x32xbf16>, vector<8x24x32xbf16>, vector<8x24x32xbf16>, vector<8x24x32xbf16> -> vector<8x24x160xbf16>
    %12 = vector.shape_cast %11 : vector<8x24x160xbf16> to vector<192x160xbf16>
    %c0_6 = arith.constant 0 : index
    %c0_7 = arith.constant 0 : index
    %13 = vector.load %arg4[%c0_6, %c0_7] : memref<160x128xbf16, #tpu.memory_space<vmem>>, vector<160x128xbf16>
    %cst = arith.constant dense<0.000000e+00> : vector<192x128xf32>
    %14 = tpu.matmul %12, %13, %cst {dimension_numbers = #tpu.dot_dimension_numbers<[1], [0], [0], [1], [0, 0, 1, 1], [], []>} : vector<192x160xbf16>, vector<160x128xbf16>, vector<192x128xf32> -> vector<192x128xf32>
    %c0_8 = arith.constant 0 : index
    %c0_9 = arith.constant 0 : index
    %15 = vector.load %arg5[%c0_8, %c0_9] : memref<1x128xf32, #tpu.memory_space<vmem>>, vector<1x128xf32>
    %16 = vector.broadcast %15 : vector<1x128xf32> to vector<192x128xf32>
    %17 = arith.addf %14, %16 : vector<192x128xf32>
    %cst_10 = arith.constant 0.000000e+00 : f32
    %18 = vector.broadcast %cst_10 : f32 to vector<192x128xf32>
    %19 = arith.maximumf %17, %18 : vector<192x128xf32>
    %20 = vector.shape_cast %19 : vector<192x128xf32> to vector<8x24x128xf32>
    %c24_i32 = arith.constant 24 : i32
    %21 = arith.muli %arg1, %c24_i32 : i32
    %22 = tpu.iota {dimensions = array<i32: 1>} : vector<8x24x128xi32>
    %23 = vector.broadcast %21 : i32 to vector<8x24x128xi32>
    %24 = arith.addi %23, %22 : vector<8x24x128xi32>
    %c0_11 = arith.constant 0 : index
    %c0_12 = arith.constant 0 : index
    %25 = vector.load %arg6[%c0_11, %c0_12] : memref<1x128xi32, #tpu.memory_space<vmem>>, vector<1x128xi32>
    %26 = vector.shape_cast %25 : vector<1x128xi32> to vector<1x1x128xi32>
    %27 = vector.broadcast %26 : vector<1x1x128xi32> to vector<8x24x128xi32>
    %28 = arith.cmpi slt, %24, %27 : vector<8x24x128xi32>
    %cst_13 = arith.constant 0.000000e+00 : f32
    %29 = vector.broadcast %cst_13 : f32 to vector<8x24x128xf32>
    %30 = arith.select %28, %20, %29 : vector<8x24x128xi1>, vector<8x24x128xf32>
    %cst_14 = arith.constant dense<0xFF800000> : vector<8x128xf32>
    %31 = vector.multi_reduction <maximumf>, %30, %cst_14 [1] : vector<8x24x128xf32> to vector<8x128xf32>
    %c0_15 = arith.constant 0 : index
    %c0_16 = arith.constant 0 : index
    %32 = vector.load %arg9[%c0_15, %c0_16] : memref<8x128xf32, #tpu.memory_space<vmem>>, vector<8x128xf32>
    %33 = arith.maximumf %32, %31 : vector<8x128xf32>
    %c0_17 = arith.constant 0 : index
    %c0_18 = arith.constant 0 : index
    %34 = vector.load %arg9[%c0_17, %c0_18] : memref<8x128xf32, #tpu.memory_space<vmem>>, vector<8x128xf32>
    tpu.vector_store %arg9[%c0_17, %c0_18], %33 {strides = array<i32>} : memref<8x128xf32, #tpu.memory_space<vmem>>, vector<8x128xf32>,
    %c0_i32_19 = arith.constant 0 : i32
    %35 = arith.cmpi eq, %arg1, %c0_i32_19 : i32
    %36 = arith.extui %35 : i1 to i32
    %c0_i32_20 = arith.constant 0 : i32
    %37 = arith.cmpi ne, %36, %c0_i32_20 : i32
    scf.if %37 {
      %c0_21 = arith.constant 0 : index
      %c0_22 = arith.constant 0 : index
      %38 = vector.load %arg9[%c0_21, %c0_22] : memref<8x128xf32, #tpu.memory_space<vmem>>, vector<8x128xf32>
      %c0_23 = arith.constant 0 : index
      %c0_24 = arith.constant 0 : index
      %39 = vector.load %arg7[%c0_23, %c0_24] : memref<128x128xbf16, #tpu.memory_space<vmem>>, vector<128x128xbf16>
      %40 = arith.extf %39 : vector<128x128xbf16> to vector<128x128xf32>
      %cst_25 = arith.constant dense<0.000000e+00> : vector<8x128xf32>
      %41 = tpu.matmul %38, %40, %cst_25 {dimension_numbers = #tpu.dot_dimension_numbers<[1], [0], [0], [1], [0, 0, 1, 1], [], []>} : vector<8x128xf32>, vector<128x128xf32>, vector<8x128xf32> -> vector<8x128xf32>
      %c0_26 = arith.constant 0 : index
      %c0_27 = arith.constant 0 : index
      %42 = vector.load %arg8[%c0_26, %c0_27] : memref<8x128xf32, #tpu.memory_space<vmem>>, vector<8x128xf32>
      tpu.vector_store %arg8[%c0_26, %c0_27], %41 {strides = array<i32>} : memref<8x128xf32, #tpu.memory_space<vmem>>, vector<8x128xf32>,
    } else {
    }
    return
  }
  func.func @transform_0(%arg0: i32, %arg1: i32) -> (i32, i32, i32) {
    %c0_i32 = arith.constant 0 : i32
    %c0_i32_0 = arith.constant 0 : i32
    return %arg0, %arg1, %c0_i32 : i32, i32, i32
  }
  func.func @transform_1(%arg0: i32, %arg1: i32) -> (i32, i32, i32) {
    %c1_i32 = arith.constant 1 : i32
    %0 = arith.addi %arg1, %c1_i32 : i32
    %c3_i32 = arith.constant 3 : i32
    %1 = arith.muli %0, %c3_i32 : i32
    %c2_i32 = arith.constant 2 : i32
    %2 = arith.minsi %1, %c2_i32 : i32
    %c0_i32 = arith.constant 0 : i32
    %c0_i32_0 = arith.constant 0 : i32
    return %arg0, %2, %c0_i32 : i32, i32, i32
  }
  func.func @transform_2(%arg0: i32, %arg1: i32) -> (i32, i32) {
    %c0_i32 = arith.constant 0 : i32
    %c0_i32_0 = arith.constant 0 : i32
    %c0_i32_1 = arith.constant 0 : i32
    return %c0_i32, %c0_i32_0 : i32, i32
  }
  func.func @transform_3(%arg0: i32, %arg1: i32) -> (i32, i32) {
    %c0_i32 = arith.constant 0 : i32
    %c0_i32_0 = arith.constant 0 : i32
    %c0_i32_1 = arith.constant 0 : i32
    return %c0_i32, %c0_i32_0 : i32, i32
  }
  func.func @transform_4(%arg0: i32, %arg1: i32) -> (i32, i32) {
    %c0_i32 = arith.constant 0 : i32
    %c0_i32_0 = arith.constant 0 : i32
    %c0_i32_1 = arith.constant 0 : i32
    return %c0_i32, %c0_i32_0 : i32, i32
  }
  func.func @transform_5(%arg0: i32, %arg1: i32) -> (i32, i32) {
    %c0_i32 = arith.constant 0 : i32
    %c0_i32_0 = arith.constant 0 : i32
    %c0_i32_1 = arith.constant 0 : i32
    return %c0_i32, %c0_i32_0 : i32, i32
  }
  func.func @transform_6(%arg0: i32, %arg1: i32) -> (i32, i32) {
    %c0_i32 = arith.constant 0 : i32
    %c0_i32_0 = arith.constant 0 : i32
    return %arg0, %c0_i32 : i32, i32
  }
}

</mosaic_0001>

<bundles_post_ra>
// kernel: textcnn_forward.1
= control target key start
LH: loop header
LB: loop body
LE: loop exit
PB: predicated region body
PF: predicated region fallthrough
CT: control target
= control target key end

     0   :  { %vm228_vm0 = vcmask 1043456   ;;  %vm406_vm1 = vcmask 1046528   ;;  %vm253_vm2 = vsmask.f32 7424  ;;  %s1540_s13 = smov 64   ;;  %s1541_s18 = smov 32   ;;  %s2163_s0 = inlined_call_operand.vmem [shape: bf16[8,24,32], index: 0, kind: input, shape index: {}, may-alias: {0,1}]   ;;  %s2164_s1 = inlined_call_operand.vmem [shape: bf16[8,24,32], index: 1, kind: input, shape index: {}, may-alias: {0,1}]   ;;  %s2165_s2 = inlined_call_operand.vmem [shape: bf16[160,128], index: 2, kind: input, shape index: {}]   ;;  %s2166_s3 = inlined_call_operand.vmem [shape: f32[1,128], index: 3, kind: input, shape index: {}]   ;;  %s2167_s4 = inlined_call_operand.vmem [shape: s32[1,128], index: 4, kind: input, shape index: {}]   ;;  %s2168_s5 = inlined_call_operand.vmem [shape: bf16[128,128], index: 5, kind: input, shape index: {}]   ;;  %s2169_s6 = inlined_call_operand.vmem [shape: f32[8,128], index: 6, kind: output, shape index: {}]  }
   0x1   :  { %v1300_v0 = vld [vmem:[%s2164_s1 + $0x8] sm:$0xf]  ;;  %v1301_v1 = vld [vmem:[%s2164_s1 + $0x14] sm:$0xf]  ;;  %v1591_v2 = vld [vmem:[%s2163_s0] sm:$0xff]   ;;  %s1542_s25 = smov 96  }
   0x2   :  { %37 = vst [vmem:[#allocation3] sm:$0xf] %v1300_v0  ;;  %39 = vst [vmem:[#allocation3 + $0x4] sm:$0xf] %v1301_v1  ;;  %v1596_v3 = vld [vmem:[%s2163_s0 + $0xc] sm:$0xff]   ;;  %v257_v7 = vshll.u32 %v1591_v2, 16 }
   0x3   :  { %v1506_v4 = vld [vmem:[%s2163_s0 + $0x8] ss:$0 sps:$4 sm:$0xff]   ;;  %v1305_v5 = vld [vmem:[%s2164_s1 + $0x44] sm:$0xf]  ;;  %v1510_v6 = vld [vmem:[%s2163_s0 + $0x14] ss:$0 sps:$4 sm:$0xff]  }
   0x4   :  { %47 = vst [vmem:[#allocation3 + $0x14] sm:$0xf] %v1305_v5  ;;  %v407_v9 = vrot.slane %v1591_v2, 1  ;;  %v410_v10 = vrot.slane %v1596_v3, 1  ;;  %v255_v11 = vshrl.u32 %v1591_v2, 16  ;;  %v271_v14 = vshll.u32 %v1596_v3, 16 }
   0x5   :  { %v259_v18 = vrot.slane %v257_v7, 1  ;;  %v1304_v19 = vld [vmem:[%s2164_s1 + $0x38] sm:$0xf]  ;;  %v1302_v25 = vld [vmem:[%s2164_s1 + $0x20] sm:$0xf]  ;;  %v269_v28 = vshrl.u32 %v1596_v3, 16 }
   0x6   :  { %45 = vst [vmem:[#allocation3 + $0x10] sm:$0xf] %v1304_v19  ;;  %v273_v29 = vrot.slane %v271_v14, 1  ;;  %41 = vst [vmem:[#allocation3 + $0x8] sm:$0xf] %v1302_v25  ;;  %v1640_v34 = vld [vmem:[%s2163_s0 + $0x3c] sm:$0xff]  }
   0x7   :  { %v260_v32 = vor.u32 %v259_v18, %v255_v11  ;;  %v464_v35 = vrot.slane %v255_v11, 1  ;;  %v465_v36 = vrot.slane %v257_v7, 2  ;;  %v471_v37 = vrot.slane %v269_v28, 1  ;;  %v1513_v42 = vld [vmem:[%s2163_s0 + $0x44] ss:$0 sps:$4 sm:$0xff]  }
   0x8   :  { %v472_v38 = vrot.slane %v271_v14, 2  ;;  %v1515_v44 = vld [vmem:[%s2163_s0 + $0x38] ss:$0 sps:$4 sm:$0xff]   ;;  %v1303_v45 = vld [vmem:[%s2164_s1 + $0x2c] sm:$0xf]  ;;  %v274_v47 = vor.u32 %v273_v29, %v269_v28  ;;  %v327_v51 = vshll.u32 %v1640_v34, 16 }
   0x9   :  { %v1507_v8 = vld [vmem:[#allocation3] ss:$0 sps:$4 sm:$0x33]   ;;  %v1511_v13 = vld [vmem:[#allocation3 + $0x4] ss:$0 sps:$4 sm:$0x33]   ;;  %v466_v52 = vor.u32 %v465_v36, %v464_v35 }
   0xa   :  { %v1612_v12 = vsel %vm228_vm0, %v1506_v4, %v1507_v8  ;;  %v1622_v20 = vsel %vm228_vm0, %v1510_v6, %v1511_v13  ;;  %43 = vst [vmem:[#allocation3 + $0xc] sm:$0xf] %v1303_v45  ;;  %vm463_vm3 = vsmask.f32 6400  ;;  %v473_v53 = vor.u32 %v472_v38, %v471_v37  ;;  %v1306_v58 = vld [vmem:[%s2164_s1 + $0x50] sm:$0xf] }
   0xb   :  { %v408_v15 = vrot.slane %v1612_v12, 1  ;;  %v261_v16 = vshll.u32 %v1612_v12, 16  ;;  %v265_v17 = vshrl.u32 %v1612_v12, 16  ;;  %v411_v23 = vrot.slane %v1622_v20, 1  ;;  %49 = vst [vmem:[#allocation3 + $0x18] sm:$0xf] %v1306_v58 }
   0xc   :  { %v275_v27 = vshll.u32 %v1622_v20, 16  ;;  %v279_v33 = vshrl.u32 %v1622_v20, 16  ;;  %v1514_v43 = vld [vmem:[#allocation3 + $0x14] ss:$0 sps:$4 sm:$0x33]   ;;  %v325_v59 = vshrl.u32 %v1640_v34, 16 }
   0xd   :  { %433 = vrot.lane.b32.xlu1 %v408_v15, %s1540_s13  ;;  %v409_v21 = vsel %vm406_vm1, %v407_v9, %v408_v15  ;;  %v263_v22 = vrot.slane %v261_v16, 1  ;;  %v467_v24 = vrot.slane %v265_v17, 1  ;;  %v468_v26 = vrot.slane %v261_v16, 2  ;;  %v1516_v49 = vld [vmem:[#allocation3 + $0x10] ss:$0 sps:$4 sm:$0x33]  }
   0xe   :  { %431 = vrot.lane.b32.xlu0 %v409_v21, %s1540_s13  ;;  %v412_v31 = vsel %vm406_vm1, %v410_v10, %v411_v23  ;;  %v277_v40 = vrot.slane %v275_v27, 1  ;;  %v474_v41 = vrot.slane %v279_v33, 1  ;;  %v475_v48 = vrot.slane %v275_v27, 2  ;;  %v1307_v1 = vld [vmem:[%s2164_s1 + $0x5c] sm:$0xf]  ;;  %v1717_v35 = vld [vmem:[%s2163_s0 + $0x24] sm:$0xff]  }
   0xf   :  { %v267_v30 = vor.u32 %v265_v17, %v263_v22  ;;  %v469_v39 = vor.u32 %v468_v26, %v467_v24  ;;  %v264_v46 = vsel %vm253_vm2, %v260_v32, %v263_v22  ;;  %v1659_v56 = vsel %vm228_vm0, %v1513_v42, %v1514_v43  ;;  %51 = vst [vmem:[#allocation3 + $0x1c] sm:$0xf] %v1307_v1  ;;  %v1687_v10 = vld [vmem:[%s2163_s0 + $0x18] sm:$0xff]   ;;  %v1518_v13 = vld [vmem:[%s2163_s0 + $0x20] ss:$0 sps:$4 sm:$0xff]  }
  0x10   :  { %v281_v50 = vor.u32 %v279_v33, %v277_v40  ;;  %v278_v54 = vsel %vm253_vm2, %v274_v47, %v277_v40  ;;  %v476_v55 = vor.u32 %v475_v48, %v474_v41  ;;  %v1662_v57 = vsel %vm228_vm0, %v1515_v44, %v1516_v49  ;;  %v1519_v14 = vld [vmem:[#allocation3 + $0x8] ss:$0 sps:$4 sm:$0x33]   ;;  %v1521_v36 = vld [vmem:[%s2163_s0 + $0x2c] ss:$0 sps:$4 sm:$0xff]   ;;  %v1530_v38 = vld [vmem:[%s2165_s2] sm:$0xff]  }
  0x11   :  { %368 = vrot.lane.b32.xlu1 %v267_v30, %s1541_s18  ;;  %v329_v60 = vrot.slane %v327_v51, 1  ;;  %v470_v61 = vsel %vm463_vm3, %v466_v52, %v469_v39  ;;  %v331_v62 = vshll.u32 %v1659_v56, 16  ;;  %v317_v63 = vshll.u32 %v1662_v57, 16  ;;  %v1522_v37 = vld [vmem:[#allocation3 + $0xc] ss:$0 sps:$4 sm:$0x33]  }
  0x12   :  { %435 = vrot.lane.b32.xlu0 %v412_v31, %s1540_s13  ;;  %v477_v0 = vsel %vm463_vm3, %v473_v53, %v476_v55  ;;  %v321_v7 = vshrl.u32 %v1662_v57, 16  ;;  %v335_v8 = vshrl.u32 %v1659_v56, 16  ;;  %v422_v9 = vrot.slane %v1640_v34, 1  ;;  %v1531_v52 = vld [vmem:[%s2165_s2 + $0x8] sm:$0xff]  }
  0x13   :  { %v330_v4 = vor.u32 %v329_v60, %v325_v59  ;;  %v333_v5 = vrot.slane %v331_v62, 1  ;;  %v1679_v6 = vrot.slane %v317_v63, 1  ;;  %v499_v11 = vrot.slane %v325_v59, 1 }
  0x14   :  { %v423_v15 = vrot.slane %v1659_v56, 1  ;;  %v500_v16 = vrot.slane %v327_v51, 2  ;;  %v502_v19 = vrot.slane %v335_v8, 1  ;;  %v503_v21 = vrot.slane %v331_v62, 2 }
  0x15   :  { %522 = vrot.lane.b32.xlu1 %v469_v39, %s1542_s25  ;;  %v334_v17 = vsel %vm253_vm2, %v330_v4, %v333_v5  ;;  %v323_v18 = vor.u32 %v321_v7, %v1679_v6  ;;  %v285_v22 = vshll.u32 %v1687_v10, 16  ;;  %v1701_v24 = vsel %vm228_vm0, %v1518_v13, %v1519_v14 }
  0x16   :  { %366 = vrot.lane.b32.xlu0 %v264_v46, %s1541_s18  ;;  %v420_v25 = vrot.slane %v1662_v57, 1  ;;  %v501_v26 = vor.u32 %v500_v16, %v499_v11  ;;  %v283_v27 = vshrl.u32 %v1687_v10, 16  ;;  %v1710_v28 = vor.u32 %v503_v21, %v502_v19 }
  0x17   :  { %v495_v29 = vrot.slane %v321_v7, 1  ;;  %v496_v30 = vrot.slane %v317_v63, 2  ;;  %v287_v31 = vrot.slane %v285_v22, 1  ;;  %v289_v32 = vshll.u32 %v1701_v24, 16 }
  0x18   :  { %v413_v33 = vrot.slane %v1687_v10, 1  ;;  %v505_v39 = vsel %vm463_vm3, %v501_v26, %v1710_v28  ;;  %v414_v41 = vrot.slane %v1701_v24, 1  ;;  %v293_v42 = vshrl.u32 %v1701_v24, 16 }
  0x19   :  { %372 = vrot.lane.b32.xlu1 %v281_v50, %s1541_s18  ;;  %v1731_v40 = vor.u32 %v496_v30, %v495_v29  ;;  %v288_v43 = vor.u32 %v287_v31, %v283_v27  ;;  %v1735_v44 = vrot.slane %v289_v32, 1  ;;  %v299_v45 = vshll.u32 %v1717_v35, 16  ;;  %v1524_v29 = vld [vmem:[%s2163_s0 + $0x50] ss:$0 sps:$4 sm:$0xff]  }
  0x1a   :  { %370 = vrot.lane.b32.xlu0 %v278_v54, %s1541_s18  ;;  %v337_v46 = vor.u32 %v335_v8, %v333_v5  ;;  %v1543_v47 = vmov 0   ;;  %v415_v48 = vsel %vm406_vm1, %v413_v33, %v414_v41  ;;  %v478_v49 = vrot.slane %v283_v27, 1  ;;  %v1532_v5 = vld [vmem:[%s2165_s2 + $0x10] sm:$0xff]   ;;  %v1799_v27 = vld [vmem:[%s2163_s0 + $0x48] sm:$0xff]  }
  0x1b   :  { %899 = vmatprep.subr.bf16.mxu0 %v1543_v47  ;;  %v479_v50 = vrot.slane %v285_v22, 2  ;;  %v481_v51 = vrot.slane %v293_v42, 1  ;;  %v292_v53 = vsel %vm253_vm2, %v288_v43, %v1735_v44  ;;  %v482_v54 = vrot.slane %v289_v32, 2  ;;  %1479 = vmatprep.subr.bf16.mxu1 %v1543_v47  ;;  %v1525_v30 = vld [vmem:[#allocation3 + $0x18] ss:$0 sps:$4 sm:$0x33]  }
  0x1c   :  { %900 = vmatpush1.bf16.msra.mxu0 %v1530_v38  ;;  %vm552_vm4 = vcmask 1045504   ;;  %v297_v58 = vshrl.u32 %v1717_v35, 16  ;;  %v301_v59 = vrot.slane %v299_v45, 1  ;;  %1489 = vmatpush1.bf16.msra.mxu1 %v1530_v38  ;;  %v553_v60 = vrot.slane %v1591_v2, 2 }
  0x1d   :  { %520 = vrot.lane.b32.xlu1 %v470_v61, %s1542_s25  ;;  %901 = vmatprep.subr.bf16.mxu0 %v1543_v47  ;;  %v554_v61 = vrot.slane %v1612_v12, 2  ;;  %v556_v62 = vrot.slane %v1596_v3, 2  ;;  %v557_v63 = vrot.slane %v1622_v20, 2  ;;  %v568_v1 = vrot.slane %v1640_v34, 2 }
  0x1e   :  { %524 = vrot.lane.b32.xlu0 %v477_v0, %s1542_s25  ;;  %1480 = vmatprep.subr.bf16.mxu1 %v1543_v47  ;;  %v566_v0 = vrot.slane %v1662_v57, 2  ;;  %vm577_vm5 = vcmask 261120   ;;  %v569_v8 = vrot.slane %v1659_v56, 2  ;;  %v1775_v11 = vor.u32 %v482_v54, %v481_v51 }
  0x1f   :  { %v555_v7 = vsel %vm552_vm4, %v553_v60, %v554_v61  ;;  %v1781_v13 = vsel %vm552_vm4, %v556_v62, %v557_v63  ;;  %v302_v21 = vor.u32 %v301_v59, %v297_v58  ;;  %v295_v32 = vor.u32 %v293_v42, %v1735_v44  ;;  %v1536_v62 = vld [vmem:[%s2165_s2 + $0x30] sm:$0xff]  }
  0x20   :  { %902 = vmatpush1.bf16.msra.mxu0 %v1531_v52  ;;  %1351 = vmatprep.mubr.msk.bf16.mxu0 %vm577_vm5, %v555_v7  ;;  %v1785_v14 = vcombine.low %v554_v61, %v1781_v13  ;;  %v570_v16 = vsel %vm552_vm4, %v568_v1, %v569_v8  ;;  %v416_v33 = vrot.slane %v1717_v35, 1  ;;  %v486_v38 = vrot.slane %v299_v45, 2  ;;  %v1858_v61 = vld [vmem:[%s2163_s0 + $0x54] sm:$0xff]   ;;  %v1528_v1 = vld [vmem:[#allocation3 + $0x1c] ss:$0 sps:$4 sm:$0x33]  }
  0x21   :  { %526 = vrot.lane.b32.xlu1 %v476_v55, %s1542_s25  ;;  %v1753_v55 = vsel %vm228_vm0, %v1521_v36, %v1522_v37  ;;  %903 = vmatprep.subr.bf16.mxu0 %v1543_v47  ;;  %v1338_v19 = vcombine.low %v566_v0, %v570_v16  ;;  %v485_v37 = vrot.slane %v297_v58, 1  ;;  %v341_v44 = vshll.u32 %v1799_v27, 16 }
  0x22   :  { %437 = vrot.lane.b32.xlu0 %v411_v23, %s1540_s13  ;;  %v424_v23 = vsel %vm406_vm1, %v422_v9, %v423_v15  ;;  %v303_v4 = vshll.u32 %v1753_v55, 16  ;;  %v480_v9 = vor.u32 %v479_v50, %v478_v49  ;;  %1490 = vmatpush1.bf16.msra.mxu1 %v1531_v52  ;;  %v307_v26 = vshrl.u32 %v1753_v55, 16 }
  0x23   :  { %1481 = vmatprep.subr.bf16.mxu1 %v1543_v47  ;;  %1358 = vmatprep.mubr.msk.bf16.mxu1 %vm577_vm5, %v1338_v19  ;;  %v417_v36 = vrot.slane %v1753_v55, 1  ;;  %v339_v50 = vshrl.u32 %v1799_v27, 16  ;;  %v343_v51 = vrot.slane %v341_v44, 1  ;;  %v355_v19 = vshll.u32 %v1858_v61, 16 }
  0x24   :  { %v305_v22 = vrot.slane %v303_v4, 1  ;;  %904 = vmatpush1.bf16.msra.mxu0 %v1532_v5  ;;  %v488_v43 = vrot.slane %v307_v26, 1  ;;  %v489_v42 = vrot.slane %v303_v4, 2  ;;  %vm610_vm6 = vcmask 523264  }
  0x25   :  { %386 = vrot.lane.b32.xlu1 %v334_v17, %s1541_s18  ;;  %v727_v17 = vunpack.c.l.b16 %v569_v8  ;;  %905 = vmatprep.subr.bf16.mxu0 %v1543_v47  ;;  %v418_v45 = vsel %vm406_vm1, %v416_v33, %v417_v36  ;;  %v344_v58 = vor.u32 %v343_v51, %v339_v50  ;;  %v506_v8 = vrot.slane %v339_v50, 1 }
  0x26   :  { %384 = vrot.lane.b32.xlu0 %v323_v18, %s1541_s18  ;;  %v725_v18 = vunpack.c.h.b16 %v570_v16  ;;  %1491 = vmatpush1.bf16.msra.mxu1 %v1532_v5  ;;  %v1839_v49 = vor.u32 %v489_v42, %v488_v43  ;;  %v309_v4 = vor.u32 %v307_v26, %v305_v22  ;;  %v425_v5 = vrot.slane %v1799_v27, 1  ;;  %v1539_v43 = vld [vmem:[%s2165_s2 + $0x48] sm:$0xff]   ;;  %v1905_v42 = vld [vmem:[%s2163_s0 + $0x30] sm:$0xff]  }
  0x27   :  { %1482 = vmatprep.subr.bf16.mxu1 %v1543_v47  ;;  %v514_v50 = vrot.slane %v355_v19, 2  ;;  %vm643_vm7 = vcmask 785408   ;;  %vm1545_vm8 = vmmov 0   ;;  %vm1166_vm12 = vcmask 1041409  }
  0x28   :  { %v1810_v31 = vpack.c.b16 %v727_v17, %v725_v18  ;;  %vm1168_vm13 = vcmask 1042434   ;;  %vm1170_vm14 = vcmask 1043459   ;;  %vm1172_vm15 = vcmask 1044484  }
  0x29   :  { %451 = vrot.lane.b32.xlu1 %v424_v23, %s1540_s13  ;;  %v484_v23 = vsel %vm463_vm3, %v480_v9, %v1775_v11  ;;  %v507_v9 = vrot.slane %v341_v44, 2  ;;  %v428_v44 = vrot.slane %v1858_v61, 1 }
  0x2a   :  { %449 = vrot.lane.b32.xlu0 %v420_v25, %s1540_s13 }
  0x2b   :  { %v508_v26 = vor.u32 %v507_v9, %v506_v8 }
  0x2d   :  { %540 = vrot.lane.b32.xlu1 %v505_v39, %s1542_s25  ;;  %v306_v39 = vsel %vm253_vm2, %v302_v21, %v305_v22  ;;  %v1537_v21 = vld [vmem:[%s2165_s2 + $0x38] sm:$0xff]  }
  0x2e   :  { %538 = vrot.lane.b32.xlu0 %v1731_v40, %s1542_s25 }
  0x31   :  { %388 = vrot.lane.b32.xlu1 %v337_v46, %s1541_s18  ;;  %v1830_v46 = vsel %vm228_vm0, %v1524_v29, %v1525_v30  ;;  %v357_v29 = vrot.slane %v355_v19, 1 }
  0x32   :  { %374 = vrot.lane.b32.xlu0 %v292_v53, %s1541_s18  ;;  %v345_v52 = vshll.u32 %v1830_v46, 16  ;;  %v1535_v53 = vld [vmem:[%s2165_s2 + $0x28] sm:$0xff]   ;;  %v349_v60 = vshrl.u32 %v1830_v46, 16  ;;  %v426_v7 = vrot.slane %v1830_v46, 1 }
  0x34   :  { %v347_v59 = vrot.slane %v345_v52, 1  ;;  %v509_v17 = vrot.slane %v349_v60, 1  ;;  %v510_v18 = vrot.slane %v345_v52, 2 }
  0x35   :  { %453 = vrot.lane.b32.xlu1 %v423_v15, %s1540_s13  ;;  %v1533_v15 = vld [vmem:[%s2165_s2 + $0x18] sm:$0xff]  }
  0x36   :  { %439 = vrot.lane.b32.xlu0 %v415_v48, %s1540_s13  ;;  %906 = vmatpush1.bf16.msra.mxu0 %v1533_v15  ;;  %v487_v48 = vor.u32 %v486_v38, %v485_v37  ;;  %v348_v16 = vsel %vm253_vm2, %v344_v58, %v347_v59 }
  0x37   :  { %907 = vmatprep.subr.bf16.mxu0 %v1543_v47  ;;  %1492 = vmatpush1.bf16.msra.mxu1 %v1533_v15  ;;  %v511_v15 = vor.u32 %v510_v18, %v509_v17 }
  0x38   :  { %1483 = vmatprep.subr.bf16.mxu1 %v1543_v47  ;;  %v491_v54 = vsel %vm463_vm3, %v487_v48, %v1839_v49 }
  0x39   :  { %542 = vrot.lane.b32.xlu1 %v1710_v28, %s1542_s25  ;;  %v1534_v28 = vld [vmem:[%s2165_s2 + $0x20] sm:$0xff]   ;;  %v512_v33 = vsel %vm463_vm3, %v508_v26, %v511_v15 }
  0x3a   :  { %528 = vrot.lane.b32.xlu0 %v484_v23, %s1542_s25  ;;  %908 = vmatpush1.bf16.msra.mxu0 %v1534_v28  ;;  %v353_v23 = vshrl.u32 %v1858_v61, 16 }
  0x3b   :  { %909 = vmatprep.subr.bf16.mxu0 %v1543_v47  ;;  %1493 = vmatpush1.bf16.msra.mxu1 %v1534_v28 }
  0x3c   :  { %1484 = vmatprep.subr.bf16.mxu1 %v1543_v47  ;;  %v358_v37 = vor.u32 %v357_v29, %v353_v23 }
  0x3d   :  { %378 = vrot.lane.b32.xlu1 %v306_v39, %s1541_s18 }
  0x3e   :  { %376 = vrot.lane.b32.xlu0 %v295_v32, %s1541_s18  ;;  %910 = vmatpush1.bf16.msra.mxu0 %v1535_v53  ;;  %v1538_v32 = vld [vmem:[%s2165_s2 + $0x40] sm:$0xff]  }
  0x3f   :  { %911 = vmatprep.subr.bf16.mxu0 %v1543_v47  ;;  %1494 = vmatpush1.bf16.msra.mxu1 %v1535_v53  ;;  %v313_v53 = vshll.u32 %v1905_v42, 16 }
  0x40   :  { %1485 = vmatprep.subr.bf16.mxu1 %v1543_v47 }
  0x41   :  { %443 = vrot.lane.b32.xlu1 %v418_v45, %s1540_s13  ;;  %v513_v45 = vrot.slane %v353_v23, 1  ;;  %v493_v9 = vrot.slane %v313_v53, 2 }
  0x42   :  { %441 = vrot.lane.b32.xlu0 %v414_v41, %s1540_s13  ;;  %v1527_v41 = vld [vmem:[%s2163_s0 + $0x5c] ss:$0 sps:$4 sm:$0xff]   ;;  %912 = vmatpush1.bf16.msra.mxu0 %v1536_v62 }
  0x43   :  { %v1879_v22 = vsel %vm228_vm0, %v1527_v41, %v1528_v1  ;;  %913 = vmatprep.subr.bf16.mxu0 %v1543_v47  ;;  %1495 = vmatpush1.bf16.msra.mxu1 %v1536_v62  ;;  %v515_v58 = vor.u32 %v514_v50, %v513_v45  ;;  %v565_v62 = vrot.slane %v1905_v42, 2  ;;  %vm1174_vm0 = vcmask 1045509  }
  0x44   :  { %1486 = vmatprep.subr.bf16.mxu1 %v1543_v47  ;;  %v359_v30 = vshll.u32 %v1879_v22, 16  ;;  %v363_v39 = vshrl.u32 %v1879_v22, 16  ;;  %v429_v28 = vrot.slane %v1879_v22, 1 }
  0x45   :  { %532 = vrot.lane.b32.xlu1 %v491_v54, %s1542_s25  ;;  %v1927_v1 = vsel %vm552_vm4, %v565_v62, %v566_v0 }
  0x46   :  { %530 = vrot.lane.b32.xlu0 %v1775_v11, %s1542_s25  ;;  %v427_v11 = vsel %vm406_vm1, %v425_v5, %v426_v7  ;;  %914 = vmatpush1.bf16.msra.mxu0 %v1537_v21  ;;  %v361_v38 = vrot.slane %v359_v30, 1  ;;  %v516_v51 = vrot.slane %v363_v39, 1  ;;  %v517_v52 = vrot.slane %v359_v30, 2 }
  0x47   :  { %915 = vmatprep.subr.bf16.mxu0 %v1543_v47  ;;  %1496 = vmatpush1.bf16.msra.mxu1 %v1537_v21  ;;  %v430_v54 = vsel %vm406_vm1, %v428_v44, %v429_v28 }
  0x48   :  { %1487 = vmatprep.subr.bf16.mxu1 %v1543_v47  ;;  %v362_v48 = vsel %vm253_vm2, %v358_v37, %v361_v38 }
  0x49   :  { %390 = vrot.lane.b32.xlu1 %v348_v16, %s1541_s18 }
  0x4a   :  { %380 = vrot.lane.b32.xlu0 %v309_v4, %s1541_s18  ;;  %916 = vmatpush1.bf16.msra.mxu0 %v1538_v32  ;;  %v365_v4 = vor.u32 %v363_v39, %v361_v38  ;;  %v701_v38 = vunpack.c.h.b16 %v1781_v13 }
  0x4b   :  { %917 = vmatprep.subr.bf16.mxu0 %v1543_v47  ;;  %1497 = vmatpush1.bf16.msra.mxu1 %v1538_v32 }
  0x4c   :  { %1488 = vmatprep.subr.bf16.mxu1 %v1543_v47  ;;  %v518_v47 = vor.u32 %v517_v52, %v516_v51  ;;  %v559_v52 = vrot.slane %v1687_v10, 2 }
  0x4d   :  { %455 = vrot.lane.b32.xlu1 %v427_v11, %s1540_s13 }
  0x4e   :  { %445 = vrot.lane.b32.xlu0 %v417_v36, %s1540_s13  ;;  %v351_v36 = vor.u32 %v349_v60, %v347_v59  ;;  %918 = vmatpush1.bf16.msra.mxu0 %v1539_v43  ;;  %v311_v59 = vshrl.u32 %v1905_v42, 16  ;;  %v519_v60 = vsel %vm463_vm3, %v515_v58, %v518_v47 }
  0x4f   :  { %1498 = vmatpush1.bf16.msra.mxu1 %v1539_v43 }
  0x50   :  { %v492_v8 = vrot.slane %v311_v59, 1 }
  0x51   :  { %544 = vrot.lane.b32.xlu1 %v512_v33, %s1542_s25 }
  0x52   :  { %534 = vrot.lane.b32.xlu0 %v1839_v49, %s1542_s25  ;;  %v315_v49 = vrot.slane %v313_v53, 1  ;;  %v494_v16 = vor.u32 %v493_v9, %v492_v8  ;;  %v560_v53 = vrot.slane %v1701_v24, 2 }
  0x54   :  { %v316_v41 = vor.u32 %v315_v49, %v311_v59 }
  0x55   :  { %394 = vrot.lane.b32.xlu1 %v362_v48, %s1541_s18 }
  0x56   :  { %392 = vrot.lane.b32.xlu0 %v351_v36, %s1541_s18  ;;  %v320_v5 = vsel %vm253_vm2, %v316_v41, %v1679_v6  ;;  %v498_v6 = vsel %vm463_vm3, %v494_v16, %v1731_v40  ;;  %v561_v41 = vsel %vm552_vm4, %v559_v52, %v560_v53  ;;  %vm1178_vm2 = vcmask 1047559  }
  0x59   :  { %459 = vrot.lane.b32.xlu1 %v430_v54, %s1540_s13 }
  0x5a   :  { %457 = vrot.lane.b32.xlu0 %v426_v7, %s1540_s13  ;;  %v419_v7 = vrot.slane %v1905_v42, 1 }
  0x5c   :  { %v421_v0 = vsel %vm406_vm1, %v419_v7, %v420_v25  ;;  %vm1176_vm1 = vcmask 1046534  }
  0x5d   :  { %548 = vrot.lane.b32.xlu1 %v519_v60, %s1542_s25 }
  0x5e   :  { %546 = vrot.lane.b32.xlu0 %v511_v15, %s1542_s25 }
  0x61   :  { %396 = vrot.lane.b32.xlu1 %v365_v4, %s1541_s18 }
  0x62   :  { %382 = vrot.lane.b32.xlu0 %v320_v5, %s1541_s18 }
  0x65   :  { %461 = vrot.lane.b32.xlu1 %v429_v28, %s1540_s13 }
  0x66   :  { %447 = vrot.lane.b32.xlu0 %v421_v0, %s1540_s13  ;;  %v563_v0 = vrot.slane %v1753_v55, 2 }
  0x69   :  { %550 = vrot.lane.b32.xlu1 %v518_v47, %s1542_s25 }
  0x6a   :  { %536 = vrot.lane.b32.xlu0 %v498_v6, %s1542_s25 }
  0x7f   :  { %v434_v17 = vpop.permute.xlu1 %433 }
  0x80   :  { %v432_v18 = vpop.permute.xlu0 %431 }
  0x83   :  { %v369_v19 = vpop.permute.xlu1 %368 }
  0x84   :  { %v436_v21 = vpop.permute.xlu0 %435  ;;  %v581_v37 = vsel %vm577_vm5, %v1612_v12, %v369_v19 }
  0x85   :  { %v614_v28 = vsel %vm610_vm6, %v581_v37, %v434_v17 }
  0x87   :  { %v523_v11 = vpop.permute.xlu1 %522 }
  0x88   :  { %v367_v26 = vpop.permute.xlu0 %366  ;;  %v647_v13 = vsel %vm643_vm7, %v614_v28, %v523_v11 }
  0x89   :  { %v579_v25 = vsel %vm577_vm5, %v1591_v2, %v367_v26  ;;  %v703_v2 = vunpack.c.l.b16 %v557_v63 }
  0x8a   :  { %v612_v40 = vsel %vm610_vm6, %v579_v25, %v432_v18  ;;  %v571_v25 = vrot.slane %v1799_v27, 2 }
  0x8b   :  { %v373_v15 = vpop.permute.xlu1 %372  ;;  %v772_v45 = vpack.c.b16 %v703_v2, %v701_v38 }
  0x8c   :  { %v371_v23 = vpop.permute.xlu0 %370 }
  0x8d   :  { %v583_v30 = vsel %vm577_vm5, %v1596_v3, %v371_v23  ;;  %v585_v3 = vsel %vm577_vm5, %v1622_v20, %v373_v15  ;;  %v572_v23 = vrot.slane %v1830_v46, 2 }
  0x8e   :  { %v616_v39 = vsel %vm610_vm6, %v583_v30, %v436_v21 }
  0x8f   :  { %v521_v29 = vpop.permute.xlu1 %520 }
  0x90   :  { %v525_v32 = vpop.permute.xlu0 %524  ;;  %v645_v33 = vsel %vm643_vm7, %v612_v40, %v521_v29 }
  0x91   :  { %932 = vmatmul.mubr.bf16.vlgmr.msra.gmra.mrb[0].mxu0 %v645_v33  ;;  %v649_v36 = vsel %vm643_vm7, %v616_v39, %v525_v32 }
  0x92   :  { %1352 = vmatprep.mubr.msk.bf16.mxu0 %vm577_vm5, %v1785_v14  ;;  %v1333_v14 = vcombine.low %v647_v13, %v649_v36  ;;  %v700_v47 = vunpack.c.h.b16 %v649_v36  ;;  %v715_v36 = vunpack.c.l.b16 %v563_v0 }
  0x93   :  { %v527_v43 = vpop.permute.xlu1 %526 }
  0x94   :  { %v438_v44 = vpop.permute.xlu0 %437 }
  0x95   :  { %v618_v12 = vsel %vm610_vm6, %v585_v3, %v438_v44 }
  0x96   :  { %v651_v63 = vsel %vm643_vm7, %v618_v12, %v527_v43 }
  0x97   :  { %v387_v48 = vpop.permute.xlu1 %386  ;;  %v702_v51 = vunpack.c.l.b16 %v651_v63 }
  0x98   :  { %v385_v50 = vpop.permute.xlu0 %384  ;;  %v599_v54 = vsel %vm577_vm5, %v1640_v34, %v387_v48 }
  0x99   :  { %940 = vmatmul.mubr.bf16.gmra.mrb[4].mxu0 %v1333_v14  ;;  %v597_v59 = vsel %vm577_vm5, %v1662_v57, %v385_v50  ;;  %v771_v62 = vpack.c.b16 %v702_v51, %v700_v47  ;;  %v562_v57 = vrot.slane %v1717_v35, 2 }
  0x9a   :  { %1353 = vmatprep.mubr.msk.bf16.mxu0 %vm577_vm5, %v772_v45 }
  0x9b   :  { %v452_v20 = vpop.permute.xlu1 %451  ;;  %v564_v17 = vsel %vm552_vm4, %v562_v57, %v563_v0 }
  0x9c   :  { %v450_v58 = vpop.permute.xlu0 %449  ;;  %v632_v49 = vsel %vm610_vm6, %v599_v54, %v452_v20  ;;  %v1336_v21 = vcombine.low %v560_v53, %v564_v17  ;;  %v713_v3 = vunpack.c.h.b16 %v564_v17  ;;  %v575_v20 = vrot.slane %v1879_v22, 2 }
  0x9d   :  { %v630_v4 = vsel %vm610_vm6, %v597_v59, %v450_v58 }
  0x9e   :  { %v778_v63 = vpack.c.b16 %v715_v36, %v713_v3  ;;  %v1397_v3 = vld [vmem:[%s2168_s5 + $0x10] sm:$0xff]   ;;  %v1398_v36 = vld [vmem:[%s2168_s5 + $0x18] sm:$0xff]  }
  0x9f   :  { %v541_v60 = vpop.permute.xlu1 %540 }
  0xa0   :  { %v665_v5 = vsel %vm643_vm7, %v632_v49, %v541_v60  ;;  %v539_v7 = vpop.permute.xlu0 %538 }
  0xa1   :  { %v663_v8 = vsel %vm643_vm7, %v630_v4, %v539_v7  ;;  %948 = vmatmul.mubr.bf16.gmra.mrb[8].mxu0 %v771_v62  ;;  %v724_v30 = vunpack.c.h.b16 %v665_v5 }
  0xa2   :  { %v1337_v34 = vcombine.low %v663_v8, %v665_v5  ;;  %1354 = vmatprep.mubr.msk.bf16.mxu0 %vm577_vm5, %v561_v41 }
  0xa3   :  { %v389_v9 = vpop.permute.xlu1 %388 }
  0xa4   :  { %988 = vmatmul.mubr.bf16.vlgmr.msra.gmra.mrb[0].mxu1 %v1337_v34  ;;  %v375_v16 = vpop.permute.xlu0 %374  ;;  %v601_v18 = vsel %vm577_vm5, %v1659_v56, %v389_v9 }
  0xa5   :  { %1359 = vmatprep.mubr.msk.bf16.mxu1 %vm577_vm5, %v1810_v31  ;;  %v587_v11 = vsel %vm577_vm5, %v1687_v10, %v375_v16  ;;  %v573_v10 = vsel %vm552_vm4, %v571_v25, %v572_v23 }
  0xa7   :  { %v454_v6 = vpop.permute.xlu1 %453 }
  0xa8   :  { %v440_v19 = vpop.permute.xlu0 %439  ;;  %v634_v26 = vsel %vm610_vm6, %v601_v18, %v454_v6  ;;  %v739_v6 = vunpack.c.l.b16 %v575_v20 }
  0xa9   :  { %v620_v31 = vsel %vm610_vm6, %v587_v11, %v440_v19 }
  0xab   :  { %v543_v15 = vpop.permute.xlu1 %542 }
  0xac   :  { %v667_v29 = vsel %vm643_vm7, %v634_v26, %v543_v15  ;;  %v529_v40 = vpop.permute.xlu0 %528 }
  0xad   :  { %v726_v32 = vunpack.c.l.b16 %v667_v29  ;;  %v653_v56 = vsel %vm643_vm7, %v620_v31, %v529_v40 }
  0xae   :  { %956 = vmatmul.mubr.bf16.gmra.mrb[12].mxu0 %v653_v56 }
  0xaf   :  { %v379_v33 = vpop.permute.xlu1 %378  ;;  %v783_v37 = vpack.c.b16 %v726_v32, %v724_v30  ;;  %1355 = vmatprep.mubr.msk.bf16.mxu0 %vm577_vm5, %v1336_v21 }
  0xb0   :  { %v377_v38 = vpop.permute.xlu0 %376  ;;  %v591_v39 = vsel %vm577_vm5, %v1717_v35, %v379_v33  ;;  %v574_v35 = vrot.slane %v1858_v61, 2 }
  0xb1   :  { %996 = vmatmul.mubr.bf16.gmra.mrb[4].mxu1 %v783_v37  ;;  %v589_v44 = vsel %vm577_vm5, %v1701_v24, %v377_v38 }
  0xb2   :  { %1360 = vmatprep.mubr.msk.bf16.mxu1 %vm577_vm5, %v573_v10  ;;  %v576_v53 = vsel %vm552_vm4, %v574_v35, %v575_v20  ;;  %v1363_v20 = vld [vmem:[%s2167_s4] ss:$0 sm:$0xff] }
  0xb3   :  { %v444_v2 = vpop.permute.xlu1 %443  ;;  %v1340_v47 = vcombine.low %v572_v23, %v576_v53  ;;  %v737_v16 = vunpack.c.h.b16 %v576_v53 }
  0xb4   :  { %v442_v43 = vpop.permute.xlu0 %441  ;;  %v624_v28 = vsel %vm610_vm6, %v591_v39, %v444_v2 }
  0xb5   :  { %v622_v13 = vsel %vm610_vm6, %v589_v44, %v442_v43  ;;  %v1396_v43 = vld [vmem:[%s2168_s5 + $0x8] sm:$0xff]   ;;  %v1399_v44 = vld [vmem:[%s2168_s5 + $0x20] sm:$0xff]  }
  0xb7   :  { %v533_v12 = vpop.permute.xlu1 %532 }
  0xb8   :  { %v657_v45 = vsel %vm643_vm7, %v624_v28, %v533_v12  ;;  %v531_v14 = vpop.permute.xlu0 %530  ;;  %v1400_v28 = vld [vmem:[%s2168_s5 + $0x28] sm:$0xff]   ;;  %v1401_v12 = vld [vmem:[%s2168_s5 + $0x30] sm:$0xff]  }
  0xb9   :  { %v655_v48 = vsel %vm643_vm7, %v622_v13, %v531_v14  ;;  %v712_v7 = vunpack.c.h.b16 %v657_v45  ;;  %v1402_v13 = vld [vmem:[%s2168_s5 + $0x38] sm:$0xff]   ;;  %v1053_v14 = vlaneseq }
  0xba   :  { %v1335_v50 = vcombine.low %v655_v48, %v657_v45  ;;  %v1546_v45 = vmov 0.0  }
  0xbb   :  { %v391_v51 = vpop.permute.xlu1 %390  ;;  %v1054_v48 = vshrl.u32 %v1053_v14, 7 }
  0xbc   :  { %964 = vmatmul.mubr.bf16.gmra.mrb[16].mxu0 %v1335_v50  ;;  %v381_v52 = vpop.permute.xlu0 %380  ;;  %v603_v54 = vsel %vm577_vm5, %v1799_v27, %v391_v51 }
  0xbd   :  { %1356 = vmatprep.mubr.msk.bf16.mxu0 %vm577_vm5, %v778_v63  ;;  %v593_v59 = vsel %vm577_vm5, %v1753_v55, %v381_v52  ;;  %v2064_v63 = vld [vmem:[%s2166_s3] ss:$0 sm:$0xff]  ;;  %v1055_v51 = vadd.s32 8, %v1054_v48  ;;  %vm2071_vm9 = vcmp.lt.s32.totalorder %v1054_v48, %v1363_v20 }
  0xbf   :  { %v456_v24 = vpop.permute.xlu1 %455  ;;  %vm2075_vm10 = vcmp.lt.s32.totalorder %v1055_v51, %v1363_v20 }
  0xc0   :  { %v446_v58 = vpop.permute.xlu0 %445  ;;  %v636_v49 = vsel %vm610_vm6, %v603_v54, %v456_v24 }
  0xc1   :  { %v626_v62 = vsel %vm610_vm6, %v593_v59, %v446_v58 }
  0xc3   :  { %v545_v60 = vpop.permute.xlu1 %544 }
  0xc4   :  { %v535_v41 = vpop.permute.xlu0 %534  ;;  %v669_v4 = vsel %vm643_vm7, %v636_v49, %v545_v60  ;;  %v1056_v60 = vadd.s32 16, %v1054_v48 }
  0xc5   :  { %v659_v5 = vsel %vm643_vm7, %v626_v62, %v535_v41  ;;  %1004 = vmatmul.mubr.bf16.gmra.mrb[8].mxu1 %v669_v4 }
  0xc6   :  { %v714_v8 = vunpack.c.l.b16 %v659_v5  ;;  %1361 = vmatprep.mubr.msk.bf16.mxu1 %vm577_vm5, %v1340_v47  ;;  %vm2084_vm11 = vcmp.lt.s32.totalorder %v1056_v60, %v1363_v20 }
  0xc7   :  { %v395_v27 = vpop.permute.xlu1 %394 }
  0xc8   :  { %v393_v34 = vpop.permute.xlu0 %392  ;;  %v777_v9 = vpack.c.b16 %v714_v8, %v712_v7  ;;  %v607_v57 = vsel %vm577_vm5, %v1858_v61, %v395_v27 }
  0xc9   :  { %v605_v17 = vsel %vm577_vm5, %v1830_v46, %v393_v34 }
  0xca   :  { %972 = vmatmul.mubr.bf16.gmra.mrb[20].mxu0 %v777_v9 }
  0xcb   :  { %v460_v55 = vpop.permute.xlu1 %459  ;;  %1357 = vmatprep.mubr.msk.bf16.mxu0 %vm577_vm5, %v1927_v1  ;;  %v790_v1 = vpack.c.b16 %v739_v6, %v737_v16 }
  0xcc   :  { %v458_v0 = vpop.permute.xlu0 %457  ;;  %v640_v18 = vsel %vm610_vm6, %v607_v57, %v460_v55 }
  0xcd   :  { %v638_v21 = vsel %vm610_vm6, %v605_v17, %v458_v0 }
  0xcf   :  { %v549_v19 = vpop.permute.xlu1 %548 }
  0xd0   :  { %v673_v11 = vsel %vm643_vm7, %v640_v18, %v549_v19  ;;  %v547_v26 = vpop.permute.xlu0 %546 }
  0xd1   :  { %v671_v15 = vsel %vm643_vm7, %v638_v21, %v547_v26  ;;  %v736_v10 = vunpack.c.h.b16 %v673_v11 }
  0xd2   :  { %v1339_v25 = vcombine.low %v671_v15, %v673_v11 }
  0xd3   :  { %v397_v23 = vpop.permute.xlu1 %396 }
  0xd4   :  { %1012 = vmatmul.mubr.bf16.gmra.mrb[12].mxu1 %v1339_v25  ;;  %v383_v61 = vpop.permute.xlu0 %382  ;;  %v609_v46 = vsel %vm577_vm5, %v1879_v22, %v397_v23  ;;  %v1544_v22 = vmov 0.0|0.0  }
  0xd5   :  { %1362 = vmatprep.mubr.msk.bf16.mxu1 %vm577_vm5, %v790_v1  ;;  %v595_v40 = vsel %vm577_vm5, %v1905_v42, %v383_v61  ;;  %1455 = vmatprep.subr.bf16.mxu1 %v1544_v22  ;;  %v1365_v42 = vld [vmem:[%s2168_s5] sm:$0xff]  }
  0xd6   :  { %1457 = vmatpush3.bf16.msra.mxu1 %v1365_v42 }
  0xd7   :  { %v462_v31 = vpop.permute.xlu1 %461  ;;  %1458 = vmatprep.subr.bf16.mxu1 %v1544_v22 }
  0xd8   :  { %v448_v29 = vpop.permute.xlu0 %447  ;;  %v642_v30 = vsel %vm610_vm6, %v609_v46, %v462_v31 }
  0xd9   :  { %v628_v56 = vsel %vm610_vm6, %v595_v40, %v448_v29 }
  0xda   :  { %1460 = vmatpush3.bf16.msra.mxu1 %v1396_v43 }
  0xdb   :  { %v551_v32 = vpop.permute.xlu1 %550  ;;  %1461 = vmatprep.subr.bf16.mxu1 %v1544_v22 }
  0xdc   :  { %v675_v33 = vsel %vm643_vm7, %v642_v30, %v551_v32  ;;  %v537_v37 = vpop.permute.xlu0 %536 }
  0xdd   :  { %v738_v38 = vunpack.c.l.b16 %v675_v33  ;;  %v661_v2 = vsel %vm643_vm7, %v628_v56, %v537_v37 }
  0xde   :  { %980 = vmatmul.mubr.bf16.gmra.mrb[24].mxu0 %v661_v2  ;;  %1463 = vmatpush3.bf16.msra.mxu1 %v1397_v3 }
  0xdf   :  { %v789_v39 = vpack.c.b16 %v738_v38, %v736_v10  ;;  %1464 = vmatprep.subr.bf16.mxu1 %v1544_v22 }
  0xe1   :  { %1020 = vmatmul.mubr.bf16.gmra.mrb[16].mxu1 %v789_v39 }
  0xe2   :  { %1466 = vmatpush3.bf16.msra.mxu1 %v1398_v36  ;;  %1452 = vmatprep.mubr.msk.f32.mxu1 %vm1545_vm8, %v1546_v45 }
  0xe3   :  { %1467 = vmatprep.subr.bf16.mxu1 %v1544_v22 }
  0xe6   :  { %1469 = vmatpush3.bf16.msra.mxu1 %v1399_v44 }
  0xe7   :  { %1470 = vmatprep.subr.bf16.mxu1 %v1544_v22 }
  0xea   :  { %1472 = vmatpush3.bf16.msra.mxu1 %v1400_v28 }
  0xeb   :  { %1473 = vmatprep.subr.bf16.mxu1 %v1544_v22 }
  0xee   :  { %1475 = vmatpush3.bf16.msra.mxu1 %v1401_v12 }
  0xef   :  { %1476 = vmatprep.subr.bf16.mxu1 %v1544_v22 }
  0xf2   :  { %1478 = vmatpush3.bf16.msra.mxu1 %v1402_v13 }
 0x164   :  { %v933_v50 = vpop.f32.mrb[0].mxu0 }
 0x165   :  { %v934_v35 = vadd.f32 %v2064_v63, %v933_v50  ;;  %v935_v52 = vpop.f32.mrb[1].mxu0 }
 0x166   :  { %v936_v24 = vpop.f32.mrb[2].mxu0 }
 0x167   :  { %v1028_v53 = vmax.f32 %v934_v35, 0.0  ;;  %v937_v54 = vadd.f32 %v2064_v63, %v936_v24  ;;  %v938_v58 = vpop.f32.mrb[3].mxu0 }
 0x169   :  { %v1029_v49 = vmax.f32 %v937_v54, 0.0  ;;  %v1069_v62 = vsel %vm2071_vm9, %v1028_v53, 0.0 }
 0x16b   :  { %v1070_v41 = vsel %vm2075_vm10, %v1029_v49, 0.0 }
 0x16c   :  { %v1093_v4 = vmax.f32 %v1069_v62, %v1070_v41  ;;  %v941_v5 = vpop.f32.mrb[4].mxu0 }
 0x16d   :  { %v942_v7 = vadd.f32 %v2064_v63, %v941_v5  ;;  %v943_v8 = vpop.f32.mrb[5].mxu0 }
 0x16e   :  { %v944_v34 = vpop.f32.mrb[6].mxu0 }
 0x16f   :  { %v1030_v9 = vmax.f32 %v942_v7, 0.0  ;;  %v946_v55 = vpop.f32.mrb[7].mxu0  ;;  %v945_v0 = vadd.f32 %v2064_v63, %v944_v34 }
 0x171   :  { %v1071_v57 = vsel %vm2084_vm11, %v1030_v9, 0.0  ;;  %v1031_v18 = vmax.f32 %v945_v0, 0.0 }
 0x172   :  { %v1094_v16 = vmax.f32 %v1093_v4, %v1071_v57 }
 0x173   :  { %v1072_v31 = vsel %vm2071_vm9, %v1031_v18, 0.0 }
 0x174   :  { %v1095_v6 = vrot.slane %v1094_v16, 4  ;;  %v949_v17 = vpop.f32.mrb[8].mxu0 }
 0x175   :  { %v950_v19 = vadd.f32 %v2064_v63, %v949_v17  ;;  %v951_v21 = vpop.f32.mrb[9].mxu0 }
 0x176   :  { %v952_v11 = vpop.f32.mrb[10].mxu0  ;;  %v1096_v23 = vmax.f32 %v1094_v16, %v1095_v6 }
 0x177   :  { %v1032_v26 = vmax.f32 %v950_v19, 0.0  ;;  %v953_v15 = vadd.f32 %v2064_v63, %v952_v11  ;;  %v954_v1 = vpop.f32.mrb[11].mxu0  ;;  %v2093_v25 = vpop.f32.mrb[0].mxu1 }
 0x178   :  { %v991_v61 = vpop.f32.mrb[1].mxu1  ;;  %v1097_v33 = vrot.slane %v1096_v23, 2 }
 0x179   :  { %v1073_v46 = vsel %vm2075_vm10, %v1032_v26, 0.0  ;;  %v1033_v29 = vmax.f32 %v953_v15, 0.0  ;;  %v992_v40 = vpop.f32.mrb[2].mxu1 }
 0x17a   :  { %v1101_v30 = vmax.f32 %v1072_v31, %v1073_v46  ;;  %v994_v32 = vpop.f32.mrb[3].mxu1  ;;  %v1098_v38 = vmax.f32 %v1096_v23, %v1097_v33  ;;  %v993_v39 = vadd.f32 %v2064_v63, %v992_v40 }
 0x17b   :  { %v1074_v56 = vsel %vm2084_vm11, %v1033_v29, 0.0 }
 0x17c   :  { %v1102_v37 = vmax.f32 %v1101_v30, %v1074_v56  ;;  %v1099_v44 = vrot.slane %v1098_v38, 1  ;;  %v1043_v48 = vmax.f32 %v993_v39, 0.0 }
 0x17e   :  { %v1103_v10 = vrot.slane %v1102_v37, 4  ;;  %v1100_v58 = vmax.f32 %v1098_v38, %v1099_v44  ;;  %v1084_v41 = vsel %vm2071_vm9, %v1043_v48, 0.0 }
 0x180   :  { %v1104_v2 = vmax.f32 %v1102_v37, %v1103_v10 }
 0x181   :  { %v957_v22 = vpop.f32.mrb[12].mxu0 }
 0x182   :  { %v1105_v42 = vrot.slane %v1104_v2, 2  ;;  %v958_v43 = vadd.f32 %v2064_v63, %v957_v22  ;;  %v959_v3 = vpop.f32.mrb[13].mxu0 }
 0x183   :  { %v960_v36 = vpop.f32.mrb[14].mxu0 }
 0x184   :  { %v1106_v28 = vmax.f32 %v1104_v2, %v1105_v42  ;;  %v1034_v12 = vmax.f32 %v958_v43, 0.0  ;;  %v961_v13 = vadd.f32 %v2064_v63, %v960_v36  ;;  %v962_v45 = vpop.f32.mrb[15].mxu0  ;;  %v997_v14 = vpop.f32.mrb[4].mxu1 }
 0x185   :  { %v998_v50 = vadd.f32 %v2064_v63, %v997_v14  ;;  %v999_v51 = vpop.f32.mrb[5].mxu1 }
 0x186   :  { %v1107_v35 = vrot.slane %v1106_v28, 1  ;;  %v1035_v20 = vmax.f32 %v961_v13, 0.0  ;;  %v1000_v52 = vpop.f32.mrb[6].mxu1  ;;  %v1075_v60 = vsel %vm2071_vm9, %v1034_v12, 0.0 }
 0x187   :  { %v1044_v24 = vmax.f32 %v998_v50, 0.0  ;;  %v1001_v53 = vadd.f32 %v2064_v63, %v1000_v52  ;;  %v1002_v54 = vpop.f32.mrb[7].mxu1 }
 0x188   :  { %v1108_v49 = vmax.f32 %v1106_v28, %v1107_v35  ;;  %v1076_v62 = vsel %vm2075_vm10, %v1035_v20, 0.0 }
 0x189   :  { %v1109_v4 = vmax.f32 %v1075_v60, %v1076_v62  ;;  %v1085_v5 = vsel %vm2075_vm10, %v1044_v24, 0.0  ;;  %v1045_v7 = vmax.f32 %v1001_v53, 0.0 }
 0x18a   :  { %v1167_v8 = vsel %vm1166_vm12, %v1108_v49, %v1100_v58  ;;  %v1133_v34 = vmax.f32 %v1084_v41, %v1085_v5 }
 0x18b   :  { %v1086_v9 = vsel %vm2084_vm11, %v1045_v7, 0.0 }
 0x18c   :  { %v2116_v55 = vmax.f32 %v1133_v34, %v1086_v9  ;;  %v990_v9 = vadd.f32 %v2064_v63, %v2093_v25 }
 0x18f   :  { %v965_v57 = vpop.f32.mrb[16].mxu0 }
 0x190   :  { %v966_v0 = vadd.f32 %v2064_v63, %v965_v57  ;;  %v967_v16 = vpop.f32.mrb[17].mxu0 }
 0x191   :  { %v968_v6 = vpop.f32.mrb[18].mxu0 }
 0x192   :  { %v1036_v17 = vmax.f32 %v966_v0, 0.0  ;;  %v970_v18 = vpop.f32.mrb[19].mxu0  ;;  %v969_v61 = vadd.f32 %v2064_v63, %v968_v6 }
 0x194   :  { %v1077_v19 = vsel %vm2084_vm11, %v1036_v17, 0.0  ;;  %v1037_v37 = vmax.f32 %v969_v61, 0.0  ;;  %v1135_v17 = vrot.slane %v2116_v55, 4  ;;  %v1042_v61 = vmax.f32 %v990_v9, 0.0 }
 0x195   :  { %v1110_v21 = vmax.f32 %v1109_v4, %v1077_v19 }
 0x196   :  { %v1078_v12 = vsel %vm2071_vm9, %v1037_v37, 0.0 }
 0x197   :  { %v1111_v11 = vrot.slane %v1110_v21, 4 }
 0x198   :  { %v1005_v26 = vpop.f32.mrb[8].mxu1 }
 0x199   :  { %v1112_v15 = vmax.f32 %v1110_v21, %v1111_v11  ;;  %v1006_v1 = vadd.f32 %v2064_v63, %v1005_v26  ;;  %v1007_v23 = vpop.f32.mrb[9].mxu1 }
 0x19a   :  { %v1008_v31 = vpop.f32.mrb[10].mxu1 }
 0x19b   :  { %v1113_v46 = vrot.slane %v1112_v15, 2  ;;  %v1046_v29 = vmax.f32 %v1006_v1, 0.0  ;;  %v1009_v40 = vadd.f32 %v2064_v63, %v1008_v31  ;;  %v1010_v30 = vpop.f32.mrb[11].mxu1 }
 0x19c   :  { %v1136_v30 = vmax.f32 %v2116_v55, %v1135_v17 }
 0x19d   :  { %v1114_v32 = vmax.f32 %v1112_v15, %v1113_v46  ;;  %v1047_v56 = vmax.f32 %v1009_v40, 0.0  ;;  %v973_v33 = vpop.f32.mrb[20].mxu0  ;;  %v1087_v39 = vsel %vm2071_vm9, %v1046_v29, 0.0 }
 0x19e   :  { %v974_v10 = vadd.f32 %v2064_v63, %v973_v33  ;;  %v975_v38 = vpop.f32.mrb[21].mxu0 }
 0x19f   :  { %v1115_v2 = vrot.slane %v1114_v32, 1  ;;  %v1088_v22 = vsel %vm2075_vm10, %v1047_v56, 0.0  ;;  %v976_v42 = vpop.f32.mrb[22].mxu0 }
 0x1a0   :  { %v1141_v43 = vmax.f32 %v1087_v39, %v1088_v22  ;;  %v1038_v3 = vmax.f32 %v974_v10, 0.0  ;;  %v977_v36 = vadd.f32 %v2064_v63, %v976_v42  ;;  %v978_v44 = vpop.f32.mrb[23].mxu0  ;;  %v1137_v42 = vrot.slane %v1136_v30, 2 }
 0x1a1   :  { %v1116_v28 = vmax.f32 %v1114_v32, %v1115_v2 }
 0x1a2   :  { %v1079_v13 = vsel %vm2075_vm10, %v1038_v3, 0.0  ;;  %v1039_v45 = vmax.f32 %v977_v36, 0.0 }
 0x1a3   :  { %v1169_v14 = vsel %vm1168_vm13, %v1116_v28, %v1167_v8  ;;  %v1117_v48 = vmax.f32 %v1078_v12, %v1079_v13  ;;  %v1138_v28 = vmax.f32 %v1136_v30, %v1137_v42 }
 0x1a4   :  { %v1080_v50 = vsel %vm2084_vm11, %v1039_v45, 0.0 }
 0x1a5   :  { %v1118_v51 = vmax.f32 %v1117_v48, %v1080_v50  ;;  %v1139_v48 = vrot.slane %v1138_v28, 1 }
 0x1a7   :  { %v1119_v35 = vrot.slane %v1118_v51, 4  ;;  %v1013_v20 = vpop.f32.mrb[12].mxu1 }
 0x1a8   :  { %v1014_v52 = vadd.f32 %v2064_v63, %v1013_v20  ;;  %v1015_v24 = vpop.f32.mrb[13].mxu1 }
 0x1a9   :  { %v1120_v53 = vmax.f32 %v1118_v51, %v1119_v35  ;;  %v1016_v54 = vpop.f32.mrb[14].mxu1 }
 0x1aa   :  { %v1048_v58 = vmax.f32 %v1014_v52, 0.0  ;;  %v1018_v49 = vpop.f32.mrb[15].mxu1  ;;  %v1017_v7 = vadd.f32 %v2064_v63, %v1016_v54  ;;  %v1140_v52 = vmax.f32 %v1138_v28, %v1139_v48 }
 0x1ab   :  { %v1121_v60 = vrot.slane %v1120_v53, 2 }
 0x1ac   :  { %v1089_v62 = vsel %vm2084_vm11, %v1048_v58, 0.0  ;;  %v1049_v18 = vmax.f32 %v1017_v7, 0.0 }
 0x1ad   :  { %v1122_v41 = vmax.f32 %v1120_v53, %v1121_v60  ;;  %v1142_v4 = vmax.f32 %v1141_v43, %v1089_v62 }
 0x1ae   :  { %v1090_v32 = vsel %vm2071_vm9, %v1049_v18, 0.0 }
 0x1af   :  { %v1123_v5 = vrot.slane %v1122_v41, 1  ;;  %v1143_v15 = vrot.slane %v1142_v4, 4 }
 0x1b1   :  { %v1124_v8 = vmax.f32 %v1122_v41, %v1123_v5  ;;  %v981_v34 = vpop.f32.mrb[24].mxu0  ;;  %v1144_v37 = vmax.f32 %v1142_v4, %v1143_v15 }
 0x1b2   :  { %v982_v57 = vadd.f32 %v2064_v63, %v981_v34  ;;  %v983_v0 = vpop.f32.mrb[25].mxu0 }
 0x1b3   :  { %v1171_v16 = vsel %vm1170_vm14, %v1124_v8, %v1169_v14  ;;  %v984_v6 = vpop.f32.mrb[26].mxu0  ;;  %v1145_v43 = vrot.slane %v1144_v37, 2 }
 0x1b4   :  { %v1040_v19 = vmax.f32 %v982_v57, 0.0  ;;  %v985_v21 = vadd.f32 %v2064_v63, %v984_v6  ;;  %v986_v11 = vpop.f32.mrb[27].mxu0  ;;  %v1021_v26 = vpop.f32.mrb[16].mxu1 }
 0x1b5   :  { %v1022_v1 = vadd.f32 %v2064_v63, %v1021_v26  ;;  %v1023_v23 = vpop.f32.mrb[17].mxu1  ;;  %v1146_v13 = vmax.f32 %v1144_v37, %v1145_v43 }
 0x1b6   :  { %v1041_v31 = vmax.f32 %v985_v21, 0.0  ;;  %v1024_v25 = vpop.f32.mrb[18].mxu1  ;;  %v1081_v56 = vsel %vm2071_vm9, %v1040_v19, 0.0 }
 0x1b7   :  { %v1050_v46 = vmax.f32 %v1022_v1, 0.0  ;;  %v1025_v29 = vadd.f32 %v2064_v63, %v1024_v25  ;;  %v1026_v40 = vpop.f32.mrb[19].mxu1  ;;  %v1083_v63 = vsel %vm2084_vm11, %v1042_v61, 0.0  ;;  %v1147_v51 = vrot.slane %v1146_v13, 1 }
 0x1b8   :  { %v1082_v33 = vsel %vm2075_vm10, %v1041_v31, 0.0 }
 0x1b9   :  { %v1125_v10 = vmax.f32 %v1081_v56, %v1082_v33  ;;  %v1091_v38 = vsel %vm2075_vm10, %v1050_v46, 0.0  ;;  %v1051_v2 = vmax.f32 %v1025_v29, 0.0  ;;  %v1148_v24 = vmax.f32 %v1146_v13, %v1147_v51 }
 0x1ba   :  { %v1149_v39 = vmax.f32 %v1090_v32, %v1091_v38 }
 0x1bb   :  { %v1126_v55 = vmax.f32 %v1125_v10, %v1083_v63  ;;  %v1092_v22 = vsel %vm2084_vm11, %v1051_v2, 0.0 }
 0x1bc   :  { %v1150_v47 = vmax.f32 %v1149_v39, %v1092_v22 }
 0x1bd   :  { %v1127_v3 = vrot.slane %v1126_v55, 4 }
 0x1be   :  { %v1151_v36 = vrot.slane %v1150_v47, 4 }
 0x1bf   :  { %v1128_v44 = vmax.f32 %v1126_v55, %v1127_v3 }
 0x1c0   :  { %v1152_v12 = vmax.f32 %v1150_v47, %v1151_v36 }
 0x1c1   :  { %v1129_v59 = vrot.slane %v1128_v44, 2 }
 0x1c2   :  { %v1153_v45 = vrot.slane %v1152_v12, 2 }
 0x1c3   :  { %v1130_v14 = vmax.f32 %v1128_v44, %v1129_v59 }
 0x1c4   :  { %v1154_v50 = vmax.f32 %v1152_v12, %v1153_v45 }
 0x1c5   :  { %v1131_v35 = vrot.slane %v1130_v14, 1 }
 0x1c6   :  { %v1155_v20 = vrot.slane %v1154_v50, 1 }
 0x1c7   :  { %v1132_v27 = vmax.f32 %v1130_v14, %v1131_v35 }
 0x1c8   :  { %v1156_v54 = vmax.f32 %v1154_v50, %v1155_v20 }
 0x1c9   :  { %v1173_v53 = vsel %vm1172_vm15, %v1132_v27, %v1171_v16 }
 0x1ca   :  { %v1175_v58 = vsel %vm1174_vm0, %v1140_v52, %v1173_v53 }
 0x1cb   :  { %v1177_v49 = vsel %vm1176_vm1, %v1148_v24, %v1175_v58 }
 0x1cc   :  { %v1179_v60 = vsel %vm1178_vm2, %v1156_v54, %v1177_v49 }
 0x1cd   :  { %v1181_v62 = vmax.f32 %v1179_v60, 0.0 }
 0x1cf   :  { %1453 = vmatmul.mubr.f32.vlgmr.msra.gmra.mrb[20].mxu1 %v1181_v62 }
 0x2a2   :  { %v1285_v41 = vpop.f32.mrb[20].mxu1 }
 0x2a3   :  { %1289 = vst [vmem:[%s2169_s6] sm:$0xff] %v1285_v41  ;;  %v1454_v4 = vpop.f32.mrb[21].mxu1 }

</bundles_post_ra>
